<compile_context>
chip_gen: v5e
topology: v5e:2x2
jax: 0.10.0
libtpu: 0.0.40
codegen_flags: <defaults>
</compile_context>

<pallas_src>
import jax
import jax.numpy as jnp
from jax.experimental import pallas as pl
from jax.experimental.pallas import tpu as pltpu


def _proju_kernel(x_ref, u_ref, o_ref):
    # Blocks are (3, TILE_N): 3 components on sublanes, points on lanes.
    x = x_ref[...].astype(jnp.float32)
    u = u_ref[...].astype(jnp.float32)
    # <x, u> per point: pure VPU adds/muls over three (1, TILE_N) slabs.
    inner = (x[0:1, :] * u[0:1, :]
             + x[1:2, :] * u[1:2, :]
             + x[2:3, :] * u[2:3, :])            # (1, TILE_N)
    o_ref[...] = (u - inner * x).astype(o_ref.dtype)


def project_to_tangent_extrinsic(x: jax.Array, coeff: jax.Array) -> jax.Array:
    """Pallas implementation of Sphere.proju(x, coeff) for S^2 in R^3."""
    assert x.shape == coeff.shape, (x.shape, coeff.shape)
    assert x.shape[-1] == 3, "Hypersphere(dim=2) lives in R^3"
    orig_shape = x.shape
    d = orig_shape[-1]

    # SoA layout: (3, N). One-time layout plumbing in the wrapper; the kernel
    # itself is fully lane-dense.
    x2 = x.reshape(-1, d).T        # (3, N)
    u2 = coeff.reshape(-1, d).T    # (3, N)
    n = x2.shape[1]

    # Big lane tiles (multiple of 128); cap so large N still yields several
    # grid steps (keeps both v7x TensorCores busy). VMEM footprint per buffer
    # is only 8 sublanes * tile_n * 4 B, far below any scoped limit.
    tile_n = min(8192, ((n + 127) // 128) * 128)
    grid = (pl.cdiv(n, tile_n),)

    out = pl.pallas_call(
        _proju_kernel,
        out_shape=jax.ShapeDtypeStruct((d, n), coeff.dtype),
        grid=grid,
        in_specs=[
            pl.BlockSpec((d, tile_n), lambda i: (0, i)),
            pl.BlockSpec((d, tile_n), lambda i: (0, i)),
        ],
        out_specs=pl.BlockSpec((d, tile_n), lambda i: (0, i)),
        compiler_params=pltpu.CompilerParams(
            dimension_semantics=("parallel",)
        ),
    )(x2, u2)

    return out.T.reshape(orig_shape)


def _reference(x, coeff):
    return coeff - jnp.sum(x * coeff, axis=-1, keepdims=True) * x


if __name__ == "__main__":
    key = jax.random.PRNGKey(0)
    kx, ku = jax.random.split(key)

    # batch=2, num_points=8, embedding dim=3 (S^2 in R^3)
    batch, num_points, d = 2, 8, 3
    x = jax.random.normal(kx, (batch, num_points, d), dtype=jnp.float32)
    # points must lie on the sphere (ProjectToTangentExtrinsic assumes x in S^2)
    x = x / jnp.linalg.norm(x, axis=-1, keepdims=True)
    coeff = jax.random.normal(ku, (batch, num_points, d), dtype=jnp.float32)

    out = project_to_tangent_extrinsic(x, coeff)
    out = jax.block_until_ready(out)

    ref = _reference(x, coeff)
    assert out.shape == coeff.shape
    assert jnp.allclose(out, ref, atol=1e-6), "mismatch vs reference proju"
    # tangency check: <x, out> ~ 0
    assert jnp.allclose(jnp.sum(x * out, axis=-1), 0.0, atol=1e-5)

    # a larger, non-tile-multiple shape to exercise the ragged last block
    kx2, ku2 = jax.random.split(ku)
    x_big = jax.random.normal(kx2, (3, 1000, d), dtype=jnp.float32)
    x_big = x_big / jnp.linalg.norm(x_big, axis=-1, keepdims=True)
    u_big = jax.random.normal(ku2, (3, 1000, d), dtype=jnp.float32)
    out_big = jax.block_until_ready(project_to_tangent_extrinsic(x_big, u_big))
    assert jnp.allclose(out_big, _reference(x_big, u_big), atol=1e-6)

    print("KERNEL_OK")
</pallas_src>

<mosaic_0001>
module attributes {stable_mosaic.version = 11 : i64} {
  func.func @_proju_kernel(%arg0: i32, %arg1: memref<3x128xf32, #tpu.memory_space<vmem>>, %arg2: memref<3x128xf32, #tpu.memory_space<vmem>>, %arg3: memref<3x128xf32, #tpu.memory_space<vmem>>) attributes {dimension_semantics = [#tpu.dimension_semantics<parallel>], iteration_bounds = array<i64: 1>, scalar_prefetch = 0 : i64, scratch_operands = 0 : i64, tpu.core_type = #tpu.core_type<tc>, window_params = [{transform_indices = @transform_0, window_bounds = array<i64: 3, 128>}, {transform_indices = @transform_1, window_bounds = array<i64: 3, 128>}, {transform_indices = @transform_2, window_bounds = array<i64: 3, 128>}]} {
    %c0 = arith.constant 0 : index
    %c0_0 = arith.constant 0 : index
    %0 = vector.load %arg1[%c0, %c0_0] : memref<3x128xf32, #tpu.memory_space<vmem>>, vector<3x128xf32>
    %c0_1 = arith.constant 0 : index
    %c0_2 = arith.constant 0 : index
    %1 = vector.load %arg2[%c0_1, %c0_2] : memref<3x128xf32, #tpu.memory_space<vmem>>, vector<3x128xf32>
    %2 = vector.extract_strided_slice %0 {offsets = [0, 0], sizes = [1, 128], strides = [1, 1]} : vector<3x128xf32> to vector<1x128xf32>
    %3 = vector.extract_strided_slice %1 {offsets = [0, 0], sizes = [1, 128], strides = [1, 1]} : vector<3x128xf32> to vector<1x128xf32>
    %4 = arith.mulf %2, %3 : vector<1x128xf32>
    %5 = vector.extract_strided_slice %0 {offsets = [1, 0], sizes = [1, 128], strides = [1, 1]} : vector<3x128xf32> to vector<1x128xf32>
    %6 = vector.extract_strided_slice %1 {offsets = [1, 0], sizes = [1, 128], strides = [1, 1]} : vector<3x128xf32> to vector<1x128xf32>
    %7 = arith.mulf %5, %6 : vector<1x128xf32>
    %8 = arith.addf %4, %7 : vector<1x128xf32>
    %9 = vector.extract_strided_slice %0 {offsets = [2, 0], sizes = [1, 128], strides = [1, 1]} : vector<3x128xf32> to vector<1x128xf32>
    %10 = vector.extract_strided_slice %1 {offsets = [2, 0], sizes = [1, 128], strides = [1, 1]} : vector<3x128xf32> to vector<1x128xf32>
    %11 = arith.mulf %9, %10 : vector<1x128xf32>
    %12 = arith.addf %8, %11 : vector<1x128xf32>
    %13 = vector.broadcast %12 : vector<1x128xf32> to vector<3x128xf32>
    %14 = arith.mulf %13, %0 : vector<3x128xf32>
    %15 = arith.subf %1, %14 : vector<3x128xf32>
    %c0_3 = arith.constant 0 : index
    %c0_4 = arith.constant 0 : index
    %16 = vector.load %arg3[%c0_3, %c0_4] : memref<3x128xf32, #tpu.memory_space<vmem>>, vector<3x128xf32>
    tpu.vector_store %arg3[%c0_3, %c0_4], %15 {strides = array<i32>} : memref<3x128xf32, #tpu.memory_space<vmem>>, vector<3x128xf32>,
    return
  }
  func.func @transform_0(%arg0: i32) -> (i32, i32) {
    %c0_i32 = arith.constant 0 : i32
    %c0_i32_0 = arith.constant 0 : i32
    return %c0_i32, %arg0 : i32, i32
  }
  func.func @transform_1(%arg0: i32) -> (i32, i32) {
    %c0_i32 = arith.constant 0 : i32
    %c0_i32_0 = arith.constant 0 : i32
    return %c0_i32, %arg0 : i32, i32
  }
  func.func @transform_2(%arg0: i32) -> (i32, i32) {
    %c0_i32 = arith.constant 0 : i32
    %c0_i32_0 = arith.constant 0 : i32
    return %c0_i32, %arg0 : i32, i32
  }
}

</mosaic_0001>

<bundles_post_ra>
// kernel: tpu_custom_call.1
= control target key start
LH: loop header
LB: loop body
LE: loop exit
PB: predicated region body
PF: predicated region fallthrough
CT: control target
= control target key end

     0   :  { %7 = vsyncpa [#allocation3], 0  ;;  %s180_s0 = inlined_call_operand.hbm [shape: f32[3,16], index: 0, kind: input, shape index: {}]   ;;  %s181_s1 = inlined_call_operand.hbm [shape: f32[3,16], index: 1, kind: input, shape index: {}]   ;;  %s182_s2 = inlined_call_operand.hbm [shape: f32[3,16], index: 2, kind: output, shape index: {}]  }
   0x1   :  { %8 = vsyncpa [#allocation6], 0 }
   0x2   :  { %9 = vsyncpa [#allocation4], 0  ;;  %s15_s11 = sshll.u32 %s180_s0, 4  ;;  %s153_s12 = smov [#allocation2]   ;;  %s16_s11 = int_to_ptr.hbm [resolvable:$true] %s15_s11 }
   0x3   :  { %s17_s13 = sshll.u32 %s153_s12, 4  ;;  %s26_s16 = sshll.u32 %s181_s1, 4  ;;  %s18_s13 = int_to_ptr.vmem [resolvable:$true] %s17_s13  ;;  %s27_s16 = int_to_ptr.hbm [resolvable:$true] %s26_s16 }
   0x4   :  { %20 = dma.hbm_to_vmem [thread:$0]  %s16_s11, 64, %s18_s13, [#allocation3]  }
   0x5   :  { %s154_s17 = smov [#allocation5]  }
   0x6   :  { %s28_s18 = sshll.u32 %s154_s17, 4  ;;  %s29_s18 = int_to_ptr.vmem [resolvable:$true] %s28_s18 }
   0x7   :  { %31 = dma.hbm_to_vmem [thread:$0]  %s27_s16, 64, %s29_s18, [#allocation6]  }
   0x8   :  { %147 = dma.done.wait [#allocation3], 64  }
   0x9   :  { %148 = vsyncadd [#allocation3], 4294967232 }
   0xa   :  { %149 = dma.done.wait [#allocation6], 64  }
   0xb   :  { %150 = vsyncadd [#allocation6], 4294967232  ;;  %v40_v0 = vld [vmem:[#allocation2] sm:$0x7]  ;;  %v41_v1 = vld [vmem:[#allocation5] sm:$0x7] }
   0xc   :  { %v42_v2 = vmul.f32 %v41_v1, %v40_v0  ;;  %s155_s0 = smov [#allocation7]   ;;  %s61_s21 = sshll.u32 %s182_s2, 4  ;;  %s62_s21 = int_to_ptr.hbm [resolvable:$true] %s61_s21 }
   0xd   :  { %s59_s1 = sshll.u32 %s155_s0, 4  ;;  %s60_s1 = int_to_ptr.vmem [resolvable:$true] %s59_s1 }
   0xe   :  { %v44_v3 = vrot.slane %v42_v2, 1  ;;  %v47_v4 = vrot.slane %v42_v2, 2 }
  0x10   :  { %v46_v5 = vadd.f32 %v44_v3, %v42_v2 }
  0x12   :  { %v49_v6 = vadd.f32 %v47_v4, %v46_v5 }
  0x14   :  { %v50_v7 = vperm.slane %v49_v6, 0 }
  0x16   :  { %v51_v8 = vmul.f32 %v50_v7, %v40_v0 }
  0x18   :  { %v52_v9 = vsub.f32 %v41_v1, %v51_v8 }
  0x1a   :  { %53 = vst [vmem:[#allocation7] sm:$0x7] %v52_v9 }
  0x1b   :  { %64 = dma.vmem_to_hbm [thread:$0]  %s60_s1, 64, %s62_s21, [#allocation4]  }
  0x1c   :  { %151 = dma.done.wait [#allocation4], 64  }
  0x1d   :  { %152 = vsyncadd [#allocation4], 4294967232 }
  0x1e   :  { %69 = vsyncpa [#allocation3], 1 }
  0x1f   :  { %70 = vsyncpa [#allocation6], 1 }
  0x20   :  { %71 = vsyncpa [#allocation4], 1 }

</bundles_post_ra>
